<compile_context>
chip_gen: v7x
topology: tpu7x:2x2x1
jax: 0.10.0
libtpu: 0.0.40
codegen_flags: <defaults>
</compile_context>

<pallas_src>
import functools

import jax
import jax.numpy as jnp
from jax.experimental import pallas as pl
from jax.experimental.pallas import tpu as pltpu


_VMEM_BLOCK_BUDGET = 2 * 1024 * 1024   # per block buffer (padded bytes), all gens
_VMEM_LIMIT = 32 * 1024 * 1024         # scoped VMEM limit, safe on v5e/v6e/v7x


def _round_up(v, m):
    return ((v + m - 1) // m) * m


def _round_down(v, m):
    return (v // m) * m


def _canonical_dim(dim, ndim):
    if dim is None:
        # torch.nn.functional.softmax legacy default when dim is None.
        return 0 if ndim in (0, 1, 3) else 1
    return dim % ndim


def _softmax_lane_kernel(x_ref, o_ref):
    """Block (tile_rows, n); softmax along the last (lane) axis."""
    x = x_ref[...].astype(jnp.float32)
    m = jnp.max(x, axis=-1, keepdims=True)
    e = jnp.exp(x - m)
    s = jnp.sum(e, axis=-1, keepdims=True)
    o_ref[...] = (e / s).astype(o_ref.dtype)


def _softmax_sublane_kernel(x_ref, o_ref):
    """Block (n, tile_inner); softmax along the sublane axis (axis 0)."""
    x = x_ref[...].astype(jnp.float32)
    m = jnp.max(x, axis=0, keepdims=True)
    e = jnp.exp(x - m)
    s = jnp.sum(e, axis=0, keepdims=True)
    o_ref[...] = (e / s).astype(o_ref.dtype)


def _lane_tile_rows(rows, n):
    """Pick a row tile: big enough to amortize per-step overhead, small enough
    to double-buffer in+out well under the scoped VMEM limit."""
    padded_row_bytes = _round_up(max(n, 1), 128) * 4     # f32 compute, lane-padded
    t = max(8, _VMEM_BLOCK_BUDGET // padded_row_bytes)
    t = min(t, rows)
    if t == rows:
        # Whole array fits in one block: split in two so v7x's 2 TCs both work.
        if rows > 8:
            t = min(rows, _round_up(-(-rows // 2), 8))
    else:
        t = max(8, _round_down(t, 8))
    return t


def _sublane_tile_inner(inner, n, outer):
    """Pick the lane-axis tile for the non-last-dim path (multiple of 128 or
    the full inner extent)."""
    padded_col_bytes = _round_up(max(n, 1), 8) * 4
    t = max(128, _round_down(_VMEM_BLOCK_BUDGET // padded_col_bytes, 128))
    if t >= inner:
        t = inner
        # Keep at least 2 grid steps when possible (v7x megacore).
        if outer == 1 and inner > 256:
            t = min(inner, _round_up(-(-inner // 2), 128))
    return t


@functools.partial(jax.jit, static_argnames=("dim",))
def pallas_softmax(x, dim=None):
    """Softmax along `dim` (PyTorch nn.Softmax semantics), Pallas TPU hot path."""
    ndim = x.ndim
    if ndim == 0:
        return jnp.ones_like(x)
    axis = _canonical_dim(dim, ndim)
    shape = x.shape
    n = shape[axis]

    if axis == ndim - 1:
        # --- softmax along the last axis: reduce along lanes ------------------
        rows = 1
        for d in shape[:-1]:
            rows *= d
        rows = max(rows, 1)
        x2 = x.reshape(rows, n)                      # free view, no HBM copy
        tile_rows = _lane_tile_rows(rows, n)
        grid = (pl.cdiv(rows, tile_rows),)
        out2 = pl.pallas_call(
            _softmax_lane_kernel,
            out_shape=jax.ShapeDtypeStruct((rows, n), x.dtype),
            grid_spec=pltpu.PrefetchScalarGridSpec(
                num_scalar_prefetch=0,
                grid=grid,
                in_specs=[pl.BlockSpec((tile_rows, n), lambda i: (i, 0))],
                out_specs=pl.BlockSpec((tile_rows, n), lambda i: (i, 0)),
            ),
            compiler_params=pltpu.CompilerParams(
                dimension_semantics=("parallel",),
                vmem_limit_bytes=_VMEM_LIMIT,
            ),
        )(x2)
        return out2.reshape(shape)

    # --- softmax along a non-last axis: view as (outer, n, inner) -------------
    # This reshape is free (no HBM transpose); the reduction runs along the
    # sublane axis and the output's last (lane) dim stays dense.
    outer = 1
    for d in shape[:axis]:
        outer *= d
    inner = 1
    for d in shape[axis + 1:]:
        inner *= d
    x3 = x.reshape(outer, n, inner)
    tile_inner = _sublane_tile_inner(inner, n, outer)
    grid = (outer, pl.cdiv(inner, tile_inner))
    out3 = pl.pallas_call(
        _softmax_sublane_kernel,
        out_shape=jax.ShapeDtypeStruct((outer, n, inner), x.dtype),
        grid_spec=pltpu.PrefetchScalarGridSpec(
            num_scalar_prefetch=0,
            grid=grid,
            in_specs=[pl.BlockSpec((None, n, tile_inner), lambda i, j: (i, 0, j))],
            out_specs=pl.BlockSpec((None, n, tile_inner), lambda i, j: (i, 0, j)),
        ),
        compiler_params=pltpu.CompilerParams(
            dimension_semantics=("parallel", "parallel"),
            vmem_limit_bytes=_VMEM_LIMIT,
        ),
    )(x3)
    return out3.reshape(shape)


if __name__ == "__main__":
    key = jax.random.PRNGKey(0)
    # NCHW input, matching typical Softmax usage.
    x = jax.random.normal(key, (2, 4, 16, 32), dtype=jnp.float32)

    # Softmax along the last dim (W): lane-reduction path.
    y_last = jax.block_until_ready(pallas_softmax(x, dim=-1))
    ref_last = jax.nn.softmax(x, axis=-1)
    assert y_last.shape == x.shape and y_last.dtype == x.dtype
    assert jnp.allclose(y_last, ref_last, atol=1e-5, rtol=1e-5)
    assert jnp.allclose(jnp.sum(y_last, axis=-1), 1.0, atol=1e-4)

    # Softmax along the channel dim (C): sublane-reduction path (no transpose).
    y_chan = jax.block_until_ready(pallas_softmax(x, dim=1))
    ref_chan = jax.nn.softmax(x, axis=1)
    assert y_chan.shape == x.shape and y_chan.dtype == x.dtype
    assert jnp.allclose(y_chan, ref_chan, atol=1e-5, rtol=1e-5)
    assert jnp.allclose(jnp.sum(y_chan, axis=1), 1.0, atol=1e-4)

    print("KERNEL_OK")
</pallas_src>

<mosaic_0001>
module attributes {stable_mosaic.version = 11 : i64} {
  func.func @_softmax_lane_kernel(%arg0: i32, %arg1: memref<64x32xf32, #tpu.memory_space<vmem>>, %arg2: memref<64x32xf32, #tpu.memory_space<vmem>>) attributes {dimension_semantics = [#tpu.dimension_semantics<parallel>], iteration_bounds = array<i64: 2>, scalar_prefetch = 0 : i64, scratch_operands = 0 : i64, tpu.core_type = #tpu.core_type<tc>, window_params = [{transform_indices = @transform_0, window_bounds = array<i64: 64, 32>}, {transform_indices = @transform_1, window_bounds = array<i64: 64, 32>}]} {
    %c0 = arith.constant 0 : index
    %c0_0 = arith.constant 0 : index
    %0 = vector.load %arg1[%c0, %c0_0] : memref<64x32xf32, #tpu.memory_space<vmem>>, vector<64x32xf32>
    %cst = arith.constant dense<0xFF800000> : vector<64xf32>
    %1 = vector.multi_reduction <maximumf>, %0, %cst [1] : vector<64x32xf32> to vector<64xf32>
    %2 = vector.shape_cast %1 : vector<64xf32> to vector<64x1xf32>
    %3 = vector.broadcast %2 : vector<64x1xf32> to vector<64x32xf32>
    %4 = arith.subf %0, %3 : vector<64x32xf32>
    %5 = math.exp %4 : vector<64x32xf32>
    %cst_1 = arith.constant dense<0.000000e+00> : vector<64xf32>
    %6 = vector.multi_reduction <add>, %5, %cst_1 [1] : vector<64x32xf32> to vector<64xf32>
    %7 = vector.shape_cast %6 : vector<64xf32> to vector<64x1xf32>
    %8 = vector.broadcast %7 : vector<64x1xf32> to vector<64x32xf32>
    %9 = arith.divf %5, %8 : vector<64x32xf32>
    %c0_2 = arith.constant 0 : index
    %c0_3 = arith.constant 0 : index
    %10 = vector.load %arg2[%c0_2, %c0_3] : memref<64x32xf32, #tpu.memory_space<vmem>>, vector<64x32xf32>
    tpu.vector_store %arg2[%c0_2, %c0_3], %9 {strides = array<i32>} : memref<64x32xf32, #tpu.memory_space<vmem>>, vector<64x32xf32>,
    return
  }
  func.func @transform_0(%arg0: i32) -> (i32, i32) {
    %c0_i32 = arith.constant 0 : i32
    %c0_i32_0 = arith.constant 0 : i32
    return %arg0, %c0_i32 : i32, i32
  }
  func.func @transform_1(%arg0: i32) -> (i32, i32) {
    %c0_i32 = arith.constant 0 : i32
    %c0_i32_0 = arith.constant 0 : i32
    return %arg0, %c0_i32 : i32, i32
  }
}

</mosaic_0001>

<bundles_post_ra>
// kernel: pallas_softmax.1
= control target key start
LH: loop header
LB: loop body
LE: loop exit
PB: predicated region body
PF: predicated region fallthrough
CT: control target
= control target key end

     0   :  { %6 = vsyncpa [#allocation3], 0  ;;  %s731_s0 = inlined_call_operand.hbm [shape: f32[128,32], index: 0, kind: input, shape index: {}]   ;;  %s732_s1 = inlined_call_operand.hbm [shape: f32[128,32], index: 1, kind: output, shape index: {}]  }
   0x1   :  { %8 = vsyncpa [#allocation3 + $0x1], 0 }
   0x2   :  { %9 = vsyncpa [#allocation4], 0 }
   0x3   :  { %11 = vsyncpa [#allocation4 + $0x1], 0  ;;  %s541_s6 = smov 0   ;;  %s543_s7 = smov 0  }
   0x4   :  { %s545_s8 = smov 0   ;;  %s547_s9 = smov 0  }
   0x5 LB: > { %s562_s10 = sadd.s32 4294967295, %s523_s9   ;;  %s329_s11 = sadd.s32 4294967294, %s523_s9   ;;  %s523_s9 = sphi %s547_s9, %s745_s9   ;;  %s519_s8 = sphi %s545_s8, %s744_s8   ;;  %s515_s7 = sphi %s543_s7, %s743_s7   ;;  %s511_s6 = sphi %s541_s6, %s742_s6  }
   0x6   : > { %s566_s12 = sadd.s32 1, %s523_s9   ;;  %s24_s13 = sadd.s32 1, %s519_s8 }
   0x7   : > { %s21_s14 = ssub.s32 %s523_s9, %s566_s12  ;;  %p31_p0 = scmp.ne.s32.totalorder %s519_s8, %s515_s7 }
   0x8   : > { %p22_p1 = scmp.eq.s32.totalorder %s21_s14, 0  ;;  %p32_p2 = scmp.eq.s32.totalorder %s523_s9, 0 }
   0x9   : > { %p37_p3 = scmp.ne.s32.totalorder %s515_s7, %s511_s6  ;;  %p38_p4 = scmp.eq.s32.totalorder %s562_s10, 0 }
   0xa   : > { %s578_s15 = scalar_select %p22_p1, %s519_s8, %s24_s13  }
   0xb   : > { %p580_p5 = por %p32_p2, %p31_p0  ;;  %p584_p6 = por %p38_p4, %p37_p3 }
   0xc   : > { %p61_p7 = scmp.eq.s32.totalorder %s562_s10, 1  ;;  %p67_p8 = scmp.eq.s32.totalorder %s329_s11, 1 }
   0xd   : > { %p357_p10 = scmp.lt.s32.totalorder %s523_s9, 2  ;;  %s87_s20 = sand.u32 1, %s519_s8  }
   0xe   : > { %p591_p11 = por %p61_p7, %p31_p0  ;;  %p595_p12 = por %p67_p8, %p37_p3 }
   0xf   : > { %s343_s21 = sshll.u32 %s523_s9, 10  ;;  %s332_s22 = sshll.u32 %s87_s20, 6 }
  0x10   : > { %s736_s18 = scalar_select %p591_p11, 1, 0 }
  0x11   : > { %s737_s19 = scalar_select %p595_p12, 1, 0 }
  0x12   : > { %s604_s25 = scalar_lea.hbm %s731_s0, %s343_s21  ;;  %s91_s26 = scalar_lea.vmem [#allocation2], %s332_s22 }
  0x13   : > { %s98_s27 = sshll.u32 %s91_s26, 4  ;;  %p608_p13 = pnand %p357_p10, %p580_p5  ;;  %s612_s27 = int_to_ptr.vmem [resolvable:$true] %s98_s27 }
  0x14   : > { %s614_s29 = scalar_lea.sflag [#allocation3], %s87_s20  ;;  %s427_s30 = scalar_lea.hbm %s604_s25, 1024 }
  0x15   : > { %p428_p0 = scmp.ne.s32.totalorder %s604_s25, %s427_s30  ;;  %p429_p1 = pneg %p608_p13 }
  0x16   : > { %s432_s4 = scalar_lea.hbm %s731_s0, 2048  ;;  %p433_p4 = scmp.lt.u32.totalorder %s604_s25, %s731_s0 }
  0x17   : > { %p430_p2 = pnand %p429_p1, %p428_p0  ;;  %p434_p5 = scmp.lt.u32.totalorder %s432_s4, %s427_s30 }
  0x18   : > { %p436_p8 = scmp.lt.u32.totalorder %s427_s30, %s604_s25 }
  0x19   : > { %p431_p3 = pneg %p430_p2  ;;  %p435_p7 = por %p434_p5, %p433_p4 }
  0x1b   : > { %p437_p10 = por %p436_p8, %p435_p7 }
  0x1d   : > { %p438_p9 = pnand %p437_p10, %p431_p3 }
  0x1f   : > { %441 = shalt.err (!%p438_p9)
}
  0x20   : > { %s442_s13 = scalar_lea.vmem %s612_s27, 1024  ;;  %s525_s14 = smov [#allocation2]  }
  0x21   : > { %p443_p0 = scmp.ne.s32.totalorder %s612_s27, %s442_s13  ;;  %s447_s16 = sshll.u32 %s525_s14, 4  ;;  %s448_s16 = int_to_ptr.vmem [resolvable:$false] %s447_s16 }
  0x22   : > { %s449_s20 = scalar_lea.vmem %s448_s16, 2048  ;;  %p450_p11 = scmp.lt.s32.totalorder %s612_s27, %s448_s16 }
  0x23   : > { %p445_p2 = pnand %p443_p0, %p429_p1  ;;  %p451_p4 = scmp.lt.s32.totalorder %s449_s20, %s442_s13 }
  0x25   : > { %p446_p12 = pneg %p445_p2  ;;  %p452_p5 = por %p451_p4, %p450_p11 }
  0x27   : > { %p453_p7 = pnand %p452_p5, %p446_p12 }
  0x29   : > { %456 = shalt.err (!%p453_p7)
}
  0x2a   : > { %s526_s21 = smov 128   ;;  %s527_s22 = smov 8  }
  0x2b   : > { %352 = dma.hbm_to_vmem [thread:$0]  (!%p608_p13), %s604_s25, 1024, %s612_s27, %s614_s29, %s526_s21, %s526_s21, %s527_s22  }
  0x2c   : > { %p335_p9 = scmp.ge.s32.totalorder %s523_s9, 1  ;;  %p106_p1 = scmp.lt.s32.totalorder %s523_s9, 3 }
  0x2e   : > { %p107_p3 = pnand %p335_p9, %p106_p1 }
  0x2f   : > { %s645_s23 = sand.u32 (!%p107_p3), 1, %s515_s7  }
  0x30   : > { %110 = sbr.rel (%p107_p3) target bundleno = 402 (0x192), region = 24  ;;  %s336_s24 = sshll.u32 (!%p107_p3), %s645_s23, 6 }
  0x31   : > { %s113_s26 = scalar_lea.sflag (!%p107_p3), [#allocation3], %s645_s23  ;;  %s116_s30 = scalar_lea.vmem (!%p107_p3), [#allocation2], %s336_s24 }
  0x37   : > { %502 = dma.done.wait (%p584_p6), %s113_s26, 1024  }
  0x38   : > { %504 = vsyncadd (%p584_p6), %s113_s26, 4294966272  ;;  %vm145_vm0 = vcmask 261120   ;;  %v137_v0 = vld [vmem:[%s116_s30] sm:$0xff]  ;;  %v139_v1 = vld [vmem:[%s116_s30 + $0x10] sm:$0xff]  ;;  %s134_s17 = scalar_lea.vmem [#allocation5], %s336_s24  ;;  %s344_s25 = sshll.u32 %s562_s10, 10 }
  0x39   : > { %v138_v2 = vld [vmem:[%s116_s30 + $0x8] sm:$0xff]  ;;  %v146_v3 = vsel %vm145_vm0, %v137_v0, -inf  ;;  %v152_v4 = vsel %vm145_vm0, %v139_v1, -inf  ;;  %v140_v5 = vld [vmem:[%s116_s30 + $0x18] sm:$0xff]  ;;  %v141_v8 = vld [vmem:[%s116_s30 + $0x20] sm:$0xff]  ;;  %s256_s27 = sshll.u32 %s134_s17, 4  ;;  %s684_s2 = scalar_lea.hbm %s732_s1, %s344_s25  ;;  %s686_s27 = int_to_ptr.vmem [resolvable:$true] %s256_s27 }
  0x3a   : > { %147 = vmax.xlane.f32.xlu0 %v146_v3  ;;  %153 = vmax.xlane.f32.xlu1 %v152_v4  ;;  %v149_v6 = vsel %vm145_vm0, %v138_v2, -inf  ;;  %v155_v7 = vsel %vm145_vm0, %v140_v5, -inf  ;;  %v142_v9 = vld [vmem:[%s116_s30 + $0x28] sm:$0xff]  ;;  %v158_v10 = vsel %vm145_vm0, %v141_v8, -inf  ;;  %v143_v12 = vld [vmem:[%s116_s30 + $0x30] sm:$0xff]  ;;  %v144_v13 = vld [vmem:[%s116_s30 + $0x38] sm:$0xff] }
  0x3b   : > { %v161_v11 = vsel %vm145_vm0, %v142_v9, -inf  ;;  %v164_v14 = vsel %vm145_vm0, %v143_v12, -inf  ;;  %v167_v15 = vsel %vm145_vm0, %v144_v13, -inf  ;;  %s243_s10 = scalar_lea.sflag [#allocation4], %s645_s23  ;;  %s457_s3 = scalar_lea.vmem %s686_s27, 1024 }
  0x3c   : > { %p458_p6 = scmp.ne.s32.totalorder %s686_s27, %s457_s3  ;;  %p739_p11 = scmp.ne.s32.totalorder %s736_s18, 0 }
  0x3d   : > { %s528_s4 = smov [#allocation5]  }
  0x3e   : > { %150 = vmax.xlane.f32.xlu0 %v149_v6  ;;  %156 = vmax.xlane.f32.xlu1 %v155_v7  ;;  %p459_p12 = pnand %p458_p6, %p739_p11  ;;  %s461_s5 = sshll.u32 %s528_s4, 4  ;;  %s462_s5 = int_to_ptr.vmem [resolvable:$false] %s461_s5 }
  0x3f   : > { %s463_s11 = scalar_lea.vmem %s462_s5, 2048  ;;  %p464_p8 = scmp.lt.s32.totalorder %s686_s27, %s462_s5 }
  0x40   : > { %p460_p13 = pneg %p459_p12  ;;  %p465_p10 = scmp.lt.s32.totalorder %s463_s11, %s457_s3 }
  0x42   : > { %159 = vmax.xlane.f32.xlu0 %v158_v10  ;;  %162 = vmax.xlane.f32.xlu1 %v161_v11  ;;  %p466_p0 = por %p465_p10, %p464_p8 }
  0x44   : > { %p467_p2 = pnand %p466_p0, %p460_p13 }
  0x46   : > { %165 = vmax.xlane.f32.xlu0 %v164_v14  ;;  %168 = vmax.xlane.f32.xlu1 %v167_v15 }
  0xc7   : > { %v148_v16 = vpop.xlane.xlu0 %147  ;;  %v154_v17 = vpop.xlane.xlu1 %153 }
  0xc8   : > { %v170_v18 = vsub.f32 %v137_v0, %v148_v16  ;;  %v172_v19 = vsub.f32 %v139_v1, %v154_v17 }
  0xca   : > { %v178_v20 = vmul.f32 1.442695, %v170_v18  ;;  %v182_v21 = vmul.f32 1.442695, %v172_v19 }
  0xcb   : > { %v151_v22 = vpop.xlane.xlu0 %150  ;;  %v157_v23 = vpop.xlane.xlu1 %156 }
  0xcc   : > { %395 = vpow2.f32 %v178_v20  ;;  %v171_v24 = vsub.f32 %v138_v2, %v151_v22  ;;  %v173_v25 = vsub.f32 %v140_v5, %v157_v23 }
  0xcd   : > { %397 = vpow2.f32 %v182_v21 }
  0xce   : > { %v180_v26 = vmul.f32 1.442695, %v171_v24  ;;  %v184_v27 = vmul.f32 1.442695, %v173_v25 }
  0xcf   : > { %v160_v28 = vpop.xlane.xlu0 %159  ;;  %v163_v29 = vpop.xlane.xlu1 %162 }
  0xd0   : > { %399 = vpow2.f32 %v180_v26  ;;  %v174_v30 = vsub.f32 %v141_v8, %v160_v28  ;;  %v175_v31 = vsub.f32 %v142_v9, %v163_v29 }
  0xd1   : > { %401 = vpow2.f32 %v184_v27 }
  0xd2   : > { %v186_v32 = vmul.f32 1.442695, %v174_v30  ;;  %v188_v33 = vmul.f32 1.442695, %v175_v31 }
  0xd3   : > { %v166_v34 = vpop.xlane.xlu0 %165  ;;  %v169_v35 = vpop.xlane.xlu1 %168 }
  0xd4   : > { %403 = vpow2.f32 %v186_v32  ;;  %v176_v36 = vsub.f32 %v143_v12, %v166_v34  ;;  %v177_v37 = vsub.f32 %v144_v13, %v169_v35 }
  0xd5   : > { %405 = vpow2.f32 %v188_v33 }
  0xd6   : > { %v396_v38 = vpop.eup %395  ;;  %v190_v39 = vmul.f32 1.442695, %v176_v36  ;;  %v192_v40 = vmul.f32 1.442695, %v177_v37 }
  0xd7   : > { %v398_v41 = vpop.eup %397  ;;  %v194_v42 = vsel %vm145_vm0, %v396_v38, 0.0 }
  0xd8   : > { %407 = vpow2.f32 %v190_v39  ;;  %195 = vadd.xlane.f32.xlu0 %v194_v42  ;;  %v200_v43 = vsel %vm145_vm0, %v398_v41, 0.0 }
  0xd9   : > { %409 = vpow2.f32 %v192_v40 }
  0xda   : > { %v400_v44 = vpop.eup %399 }
  0xdb   : > { %v402_v45 = vpop.eup %401  ;;  %v197_v46 = vsel %vm145_vm0, %v400_v44, 0.0 }
  0xdc   : > { %201 = vadd.xlane.f32.xlu0 %v200_v43  ;;  %198 = vadd.xlane.f32.xlu1 %v197_v46  ;;  %v203_v47 = vsel %vm145_vm0, %v402_v45, 0.0 }
  0xde   : > { %v404_v48 = vpop.eup %403 }
  0xdf   : > { %v406_v49 = vpop.eup %405  ;;  %v206_v50 = vsel %vm145_vm0, %v404_v48, 0.0 }
  0xe0   : > { %204 = vadd.xlane.f32.xlu1 %v203_v47  ;;  %207 = vadd.xlane.f32.xlu0 %v206_v50  ;;  %v209_v51 = vsel %vm145_vm0, %v406_v49, 0.0 }
  0xe2   : > { %v408_v52 = vpop.eup %407 }
  0xe3   : > { %v410_v53 = vpop.eup %409  ;;  %v212_v54 = vsel %vm145_vm0, %v408_v52, 0.0 }
  0xe4   : > { %210 = vadd.xlane.f32.xlu1 %v209_v51  ;;  %213 = vadd.xlane.f32.xlu0 %v212_v54  ;;  %v215_v55 = vsel %vm145_vm0, %v410_v53, 0.0 }
  0xe8   : > { %216 = vadd.xlane.f32.xlu1 %v215_v55 }
 0x165   : > { %v196_v56 = vpop.xlane.xlu0 %195 }
 0x166   : > { %411 = vrcp.f32 %v196_v56 }
 0x169   : > { %v199_v57 = vpop.xlane.xlu1 %198  ;;  %v202_v58 = vpop.xlane.xlu0 %201 }
 0x16a   : > { %413 = vrcp.f32 %v199_v57 }
 0x16b   : > { %415 = vrcp.f32 %v202_v58 }
 0x16d   : > { %v205_v59 = vpop.xlane.xlu1 %204  ;;  %v208_v60 = vpop.xlane.xlu0 %207 }
 0x16e   : > { %417 = vrcp.f32 %v205_v59 }
 0x16f   : > { %419 = vrcp.f32 %v208_v60 }
 0x170   : > { %v412_v61 = vpop.eup %411 }
 0x171   : > { %v219_v62 = vmul.f32 %v412_v61, %v396_v38  ;;  %v211_v63 = vpop.xlane.xlu1 %210  ;;  %v214_v0 = vpop.xlane.xlu0 %213 }
 0x172   : > { %421 = vrcp.f32 %v211_v63 }
 0x173   : > { %234 = vst.msk [vmem:[%s134_s17] sm:$0xff] %vm145_vm0, %v219_v62  ;;  %423 = vrcp.f32 %v214_v0 }
 0x174   : > { %v414_v1 = vpop.eup %413 }
 0x175   : > { %v416_v2 = vpop.eup %415  ;;  %v221_v3 = vmul.f32 %v414_v1, %v400_v44  ;;  %v217_v4 = vpop.xlane.xlu1 %216 }
 0x176   : > { %v223_v5 = vmul.f32 %v416_v2, %v398_v41  ;;  %425 = vrcp.f32 %v217_v4 }
 0x177   : > { %235 = vst.msk [vmem:[%s134_s17 + $0x8] sm:$0xff] %vm145_vm0, %v221_v3 }
 0x178   : > { %v418_v6 = vpop.eup %417  ;;  %236 = vst.msk [vmem:[%s134_s17 + $0x10] sm:$0xff] %vm145_vm0, %v223_v5 }
 0x179   : > { %v420_v7 = vpop.eup %419  ;;  %v225_v8 = vmul.f32 %v418_v6, %v402_v45 }
 0x17a   : > { %v227_v9 = vmul.f32 %v420_v7, %v404_v48 }
 0x17b   : > { %237 = vst.msk [vmem:[%s134_s17 + $0x18] sm:$0xff] %vm145_vm0, %v225_v8 }
 0x17c   : > { %v422_v10 = vpop.eup %421  ;;  %238 = vst.msk [vmem:[%s134_s17 + $0x20] sm:$0xff] %vm145_vm0, %v227_v9 }
 0x17d   : > { %v424_v11 = vpop.eup %423  ;;  %v229_v12 = vmul.f32 %v422_v10, %v406_v49 }
 0x17e   : > { %v231_v13 = vmul.f32 %v424_v11, %v408_v52 }
 0x17f   : > { %239 = vst.msk [vmem:[%s134_s17 + $0x28] sm:$0xff] %vm145_vm0, %v229_v12 }
 0x180   : > { %v426_v14 = vpop.eup %425  ;;  %240 = vst.msk [vmem:[%s134_s17 + $0x30] sm:$0xff] %vm145_vm0, %v231_v13 }
 0x181   : > { %v233_v15 = vmul.f32 %v426_v14, %v410_v53 }
 0x183   : > { %241 = vst.msk [vmem:[%s134_s17 + $0x38] sm:$0xff] %vm145_vm0, %v233_v15 }
 0x184   : > { %470 = shalt.err (!%p467_p2)
}
 0x185   : > { %s471_s13 = scalar_lea.hbm %s684_s2, 1024  ;;  %s475_s20 = scalar_lea.hbm %s732_s1, 2048 }
 0x186   : > { %p472_p4 = scmp.ne.s32.totalorder %s684_s2, %s471_s13  ;;  %p476_p9 = scmp.lt.u32.totalorder %s684_s2, %s732_s1 }
 0x187   : > { %p477_p1 = scmp.lt.u32.totalorder %s475_s20, %s471_s13  ;;  %p479_p6 = scmp.lt.u32.totalorder %s471_s13, %s684_s2 }
 0x188   : > { %p473_p5 = pnand %p472_p4, %p739_p11 }
 0x189   : > { %p478_p3 = por %p477_p1, %p476_p9 }
 0x18a   : > { %p474_p7 = pneg %p473_p5 }
 0x18b   : > { %p480_p12 = por %p479_p6, %p478_p3 }
 0x18d   : > { %p481_p13 = pnand %p480_p12, %p474_p7 }
 0x18f   : > { %484 = shalt.err (!%p481_p13)
}
 0x190   : > { %s529_s24 = smov 128   ;;  %s530_s26 = smov 8  }
 0x191   : > { %347 = dma.vmem_to_hbm [thread:$0]  (%p739_p11), %s686_s27, 1024, %s684_s2, %s243_s10, %s529_s24, %s529_s24, %s530_s26  }
 0x192 PF: > { %s271_s30 = sand.u32 1, %s511_s6   ;;  %p740_p8 = scmp.ne.s32.totalorder %s737_s19, 0 }
 0x193   : > { %p741_p10 = scmp.ge.s32.totalorder %s523_s9, 2  ;;  %s272_s17 = scalar_lea.sflag [#allocation4], %s271_s30 }
 0x195   : > { %p354_p0 = pnand %p741_p10, %p740_p8 }
 0x197   : > { %506 = dma.done.wait (!%p354_p0), %s272_s17, 1024  }
 0x198   : > { %508 = vsyncadd (!%p354_p0), %s272_s17, 4294966272  ;;  %p14_p2 = scmp.ge.s32.totalorder %s566_s12, 4   ;;  %s742_s6 = smov %s515_s7 }
 0x199   : > { %s743_s7 = smov %s519_s8  ;;  %s744_s8 = smov %s578_s15 }
 0x19a   : > { %s745_s9 = smov %s566_s12  ;;  %16 = sbr.rel (!%p14_p2) target bundleno = 5 (0x5), region = 69 }
 0x1a1   :  { %277 = vsyncpa [#allocation3], 1 }
 0x1a2   :  { %279 = vsyncpa [#allocation3 + $0x1], 1 }
 0x1a3   :  { %280 = vsyncpa [#allocation4], 1 }
 0x1a4   :  { %282 = vsyncpa [#allocation4 + $0x1], 1 }

</bundles_post_ra>
